<compile_context>
chip_gen: v7x
topology: tpu7x:2x2x1
jax: 0.10.0
libtpu: 0.0.40
codegen_flags: <defaults>
</compile_context>

<pallas_src>
import functools

import jax
import jax.numpy as jnp
from jax.experimental import pallas as pl
from jax.experimental.pallas import tpu as pltpu


def _max_pool_kernel(x_ref, o_ref, *, hw_total, tile_l, mask_lanes):
    """One (row_tile, hw_tile) step of the global spatial-max reduction."""
    k = pl.program_id(1)
    x = x_ref[...]  # (tile_r, tile_l) in the input dtype; max is exact in bf16.

    if mask_lanes:
        # Partial last H*W tile: mask padded lanes so they cannot win the max.
        lane = jax.lax.broadcasted_iota(jnp.int32, x.shape, 1)
        valid = (k * tile_l + lane) < hw_total
        x = jnp.where(valid, x, jnp.finfo(x.dtype).min)

    blk_max = jnp.max(x, axis=1, keepdims=True)  # (tile_r, 1)

    @pl.when(k == 0)
    def _init():
        o_ref[...] = blk_max

    @pl.when(k != 0)
    def _accum():
        o_ref[...] = jnp.maximum(o_ref[...], blk_max)


def _l2norm_kernel(y_ref, o_ref):
    """Channel L2-normalization on the tiny pooled (N, C) array."""
    y = y_ref[...].astype(jnp.float32)
    norm = jnp.sqrt(jnp.sum(y * y, axis=1, keepdims=True))  # (N, 1)
    o_ref[...] = (y / (norm + 1e-7)).astype(o_ref.dtype)


def pooling_f(x, *, max_tile_r=256, max_tile_l=2048):
    """x: (N, C, H, W) float array. Returns (N, C, 1, 1), matching PyTorch PoolingF."""
    N, C, H, W = x.shape
    R, L = N * C, H * W
    x2 = x.reshape(R, L)

    # Block sizes: either the full extent (always legal) or an (8,128)-aligned tile.
    tile_r = R if R <= max_tile_r else max_tile_r  # 256 is a multiple of 8
    tile_l = L if L <= max_tile_l else max_tile_l  # 2048 is a multiple of 128
    mask_lanes = (L % tile_l) != 0

    grid = (pl.cdiv(R, tile_r), pl.cdiv(L, tile_l))

    pooled = pl.pallas_call(
        functools.partial(
            _max_pool_kernel, hw_total=L, tile_l=tile_l, mask_lanes=mask_lanes
        ),
        out_shape=jax.ShapeDtypeStruct((R, 1), x.dtype),
        grid_spec=pltpu.PrefetchScalarGridSpec(
            num_scalar_prefetch=0,
            grid=grid,
            in_specs=[pl.BlockSpec((tile_r, tile_l), lambda i, k: (i, k))],
            # Same output block across k => resident accumulator over the reduction.
            out_specs=pl.BlockSpec((tile_r, 1), lambda i, k: (i, 0)),
        ),
        compiler_params=pltpu.CompilerParams(
            dimension_semantics=("parallel", "arbitrary"),
            vmem_limit_bytes=32 * 1024 * 1024,
        ),
    )(x2)

    # Free reshape: C moves to the lane axis => lane-dense epilogue kernel.
    pooled_nc = pooled.reshape(N, C)

    out_nc = pl.pallas_call(
        _l2norm_kernel,
        out_shape=jax.ShapeDtypeStruct((N, C), x.dtype),
        grid_spec=pltpu.PrefetchScalarGridSpec(
            num_scalar_prefetch=0,
            grid=(1,),
            in_specs=[pl.BlockSpec((N, C), lambda i: (0, 0))],
            out_specs=pl.BlockSpec((N, C), lambda i: (0, 0)),
        ),
        compiler_params=pltpu.CompilerParams(
            dimension_semantics=("arbitrary",),
        ),
    )(pooled_nc)

    return out_nc.reshape(N, C, 1, 1)


def _reference(x):
    # Pure-JAX reference mirroring the PyTorch forward.
    y = jnp.max(x, axis=(2, 3), keepdims=True)  # (N, C, 1, 1)
    norm = jnp.power(jnp.sum(jnp.power(y, 2), axis=1, keepdims=True), 0.5)
    return y / (norm + 1e-7)


if __name__ == "__main__":
    key = jax.random.PRNGKey(0)
    k0, k1, k2 = jax.random.split(key, 3)

    # Primary small shape (matches the module's expected NCHW input).
    x = jax.random.normal(k0, (2, 4, 16, 16), dtype=jnp.float32)
    out = jax.block_until_ready(pooling_f(x))
    ref = _reference(x)
    assert out.shape == (2, 4, 1, 1), out.shape
    assert jnp.allclose(out, ref, atol=1e-5, rtol=1e-5), "mismatch (primary)"

    # Exercise the tiled H*W reduction + partial-lane masking (L=2304 > 2048).
    xb = jax.random.normal(k1, (3, 5, 48, 48), dtype=jnp.float32)
    outb = jax.block_until_ready(pooling_f(xb))
    assert jnp.allclose(outb, _reference(xb), atol=1e-5, rtol=1e-5), "mismatch (hw-tiled)"

    # Exercise row tiling with a partial last row tile (R=672, non-128 L).
    xc = jax.random.normal(k2, (7, 96, 17, 19), dtype=jnp.float32)
    outc = jax.block_until_ready(pooling_f(xc))
    assert jnp.allclose(outc, _reference(xc), atol=1e-5, rtol=1e-5), "mismatch (row-tiled)"

    print("KERNEL_OK")
</pallas_src>

<mosaic_0001>
module attributes {stable_mosaic.version = 11 : i64} {
  func.func @_max_pool_kernel(%arg0: i32, %arg1: i32, %arg2: memref<8x256xf32, #tpu.memory_space<vmem>>, %arg3: memref<8x1xf32, #tpu.memory_space<vmem>>) attributes {dimension_semantics = [#tpu.dimension_semantics<parallel>, #tpu.dimension_semantics<arbitrary>], iteration_bounds = array<i64: 1, 1>, scalar_prefetch = 0 : i64, scratch_operands = 0 : i64, tpu.core_type = #tpu.core_type<tc>, window_params = [{transform_indices = @transform_0, window_bounds = array<i64: 8, 256>}, {transform_indices = @transform_1, window_bounds = array<i64: 8, 1>}]} {
    %c0 = arith.constant 0 : index
    %c0_0 = arith.constant 0 : index
    %0 = vector.load %arg2[%c0, %c0_0] : memref<8x256xf32, #tpu.memory_space<vmem>>, vector<8x256xf32>
    %cst = arith.constant dense<0xFF800000> : vector<8xf32>
    %1 = vector.multi_reduction <maximumf>, %0, %cst [1] : vector<8x256xf32> to vector<8xf32>
    %2 = vector.shape_cast %1 : vector<8xf32> to vector<8x1xf32>
    %c0_i32 = arith.constant 0 : i32
    %3 = arith.cmpi eq, %arg1, %c0_i32 : i32
    %4 = arith.extui %3 : i1 to i32
    %c0_i32_1 = arith.constant 0 : i32
    %5 = arith.cmpi ne, %4, %c0_i32_1 : i32
    scf.if %5 {
      %c0_4 = arith.constant 0 : index
      %c0_5 = arith.constant 0 : index
      %9 = vector.load %arg3[%c0_4, %c0_5] : memref<8x1xf32, #tpu.memory_space<vmem>>, vector<8x1xf32>
      tpu.vector_store %arg3[%c0_4, %c0_5], %2 {strides = array<i32>} : memref<8x1xf32, #tpu.memory_space<vmem>>, vector<8x1xf32>,
    } else {
    }
    %c0_i32_2 = arith.constant 0 : i32
    %6 = arith.cmpi ne, %arg1, %c0_i32_2 : i32
    %7 = arith.extui %6 : i1 to i32
    %c0_i32_3 = arith.constant 0 : i32
    %8 = arith.cmpi ne, %7, %c0_i32_3 : i32
    scf.if %8 {
      %c0_4 = arith.constant 0 : index
      %c0_5 = arith.constant 0 : index
      %9 = vector.load %arg3[%c0_4, %c0_5] : memref<8x1xf32, #tpu.memory_space<vmem>>, vector<8x1xf32>
      %10 = arith.maximumf %9, %2 : vector<8x1xf32>
      %c0_6 = arith.constant 0 : index
      %c0_7 = arith.constant 0 : index
      %11 = vector.load %arg3[%c0_6, %c0_7] : memref<8x1xf32, #tpu.memory_space<vmem>>, vector<8x1xf32>
      tpu.vector_store %arg3[%c0_6, %c0_7], %10 {strides = array<i32>} : memref<8x1xf32, #tpu.memory_space<vmem>>, vector<8x1xf32>,
    } else {
    }
    return
  }
  func.func @transform_0(%arg0: i32, %arg1: i32) -> (i32, i32) {
    %c0_i32 = arith.constant 0 : i32
    return %arg0, %arg1 : i32, i32
  }
  func.func @transform_1(%arg0: i32, %arg1: i32) -> (i32, i32) {
    %c0_i32 = arith.constant 0 : i32
    %c0_i32_0 = arith.constant 0 : i32
    return %arg0, %c0_i32 : i32, i32
  }
}

</mosaic_0001>

<bundles_post_ra>
// kernel: tpu_custom_call.1
= control target key start
LH: loop header
LB: loop body
LE: loop exit
PB: predicated region body
PF: predicated region fallthrough
CT: control target
= control target key end

     0   :  { %6 = vsyncpa [#allocation3], 0  ;;  %s69_s6 = smov [#allocation2]   ;;  %s95_s0 = inlined_call_operand.hbm [shape: f32[8,256], index: 0, kind: input, shape index: {}]   ;;  %s96_s1 = inlined_call_operand.vmem [shape: f32[8,1], index: 1, kind: output, shape index: {}]  }
   0x1   :  { %s13_s7 = sshll.u32 %s69_s6, 4  ;;  %s45_s10 = scalar_lea.hbm %s95_s0, 256  ;;  %s14_s7 = int_to_ptr.vmem [resolvable:$true] %s13_s7 }
   0x2   :  { %p46_p0 = scmp.ne.s32.totalorder %s95_s0, %s45_s10  ;;  %p49_p1 = scmp.lt.u32.totalorder %s45_s10, %s95_s0 }
   0x4   :  { %p51_p2 = pnand %p49_p1, %p46_p0 }
   0x6   :  { %54 = shalt.err (!%p51_p2)
}
   0x7   :  { %s55_s15 = scalar_lea.vmem %s14_s7, 256  ;;  %p60_p4 = scmp.lt.s32.totalorder %s14_s7, %s14_s7 }
   0x8   :  { %p56_p3 = scmp.ne.s32.totalorder %s14_s7, %s55_s15  ;;  %p61_p5 = scmp.lt.s32.totalorder %s55_s15, %s55_s15 }
   0xa   :  { %p62_p6 = por %p61_p5, %p60_p4 }
   0xc   :  { %p63_p7 = pnand %p62_p6, %p56_p3 }
   0xe   :  { %66 = shalt.err (!%p63_p7)
}
   0xf   :  { %16 = dma.hbm_to_vmem [thread:$0]  %s95_s0, 256, %s14_s7, [#allocation3]  }
  0x10   :  { %67 = dma.done.wait [#allocation3], 256  }
  0x11   :  { %68 = vsyncadd [#allocation3], 4294967040  ;;  %v20_v0 = vld [vmem:[#allocation2] sm:$0xff]  ;;  %v21_v1 = vld [vmem:[#allocation2 + $0x8] sm:$0xff]  ;;  %vm29_vm0 = vcmask 7168  }
  0x12   :  { %v22_v2 = vmax.f32 %v20_v0, %v21_v1 }
  0x14   :  { %23 = vmax.xlane.f32.xlu0 %v22_v2 }
  0xa1   :  { %v24_v3 = vpop.xlane.xlu0 %23 }
  0xa2   :  { %30 = vst.msk [vmem:[%s96_s1] sm:$0xff] %vm29_vm0, %v24_v3 }
  0xa3   :  { %43 = vsyncpa [#allocation3], 1 }

</bundles_post_ra>
